<compile_context>
chip_gen: v5e
topology: v5e:2x2
jax: 0.10.0
libtpu: 0.0.40
codegen_flags: <defaults>
</compile_context>

<pallas_src>
from functools import partial

import jax
import jax.numpy as jnp
from jax.experimental import pallas as pl
from jax.experimental.pallas import tpu as pltpu

LOSS_LANES = 128  # lane-dense losses row: lane 0 = batch_neg, lane 1 = rec_loss


# ---------------------------------------------------------------------------
# Fused Pallas kernel: health_net + prescription_net (3 heads) + losses,
# for TB patients per grid step with weights resident in VMEM.
# ---------------------------------------------------------------------------
def _micron_kernel(hc_ref, hl_ref, wh_ref, bh_ref, w1_ref, b1_ref, w2_ref, b2_ref,
                   adj_ref, drugs_ref, loss_ref):
    tb = hc_ref.shape[0]
    n = adj_ref.shape[0]
    inv_n = 1.0 / n

    # health_net on [current; last] visit reps in ONE stacked matmul (2*TB rows).
    x = jnp.concatenate([hc_ref[...], hl_ref[...]], axis=0).astype(wh_ref.dtype)
    health = jnp.dot(x, wh_ref[...], preferred_element_type=jnp.float32) + bh_ref[...]
    hr = health[:tb, :]            # health_rep           (TB, E) f32
    hr_last = health[tb:, :]       # health_rep_last      (TB, E) f32
    hr_res = hr - hr_last          # health_residual_rep  (TB, E) f32

    # prescription_net on [hr; hr_last; hr_res] in ONE stacked chain (3*TB rows).
    p_in = jnp.concatenate([hr, hr_last, hr_res], axis=0).astype(w1_ref.dtype)
    h1 = jnp.maximum(
        jnp.dot(p_in, w1_ref[...], preferred_element_type=jnp.float32) + b1_ref[...],
        0.0)
    drugs = jnp.dot(h1.astype(w2_ref.dtype), w2_ref[...],
                    preferred_element_type=jnp.float32) + b2_ref[...]   # (3*TB, V) f32
    dr = drugs[:tb, :]
    drl = drugs[tb:2 * tb, :]
    drr = drugs[2 * tb:, :]

    drugs_ref[0, :, :] = dr        # drug_rep
    drugs_ref[1, :, :] = drl       # drug_rep_last
    drugs_ref[2, :, :] = drr       # drug_residual_rep

    # Sigmoid via exp (EUP) + reciprocal; epilogue kept in f32 (v5e has no bf16 VPU).
    s = pl.reciprocal(1.0 + jnp.exp(-dr), approx=False)
    s2 = pl.reciprocal(1.0 + jnp.exp(-(drl + drr)), approx=False)

    diff = s - s2
    rec = inv_n * jnp.sum(diff * diff, axis=1, keepdims=True)              # (TB, 1)

    # batch_neg = (1/n) * sum_ij s_i s_j A_ij  ==  (1/n) * (s @ A) . s
    s_a = jnp.dot(s, adj_ref[...], preferred_element_type=jnp.float32)     # (TB, V)
    bn = inv_n * jnp.sum(s_a * s, axis=1, keepdims=True)                   # (TB, 1)

    lane = jax.lax.broadcasted_iota(jnp.int32, (tb, LOSS_LANES), 1)
    loss_ref[...] = jnp.where(lane == 0, bn, 0.0) + jnp.where(lane == 1, rec, 0.0)


def micron_heads(hrep_cur, hrep_last, wh, bh, w1, b1, w2, b2, adj, *, tile_b=8):
    """hrep_cur/hrep_last: (B, 2E) f32. Returns drugs (3,B,V) f32, batch_neg (B,),
    rec_loss (B,)."""
    b_total, two_e = hrep_cur.shape
    v = w2.shape[1]
    tb = tile_b
    b_pad = ((b_total + tb - 1) // tb) * tb
    if b_pad != b_total:
        pad = ((0, b_pad - b_total), (0, 0))
        hrep_cur = jnp.pad(hrep_cur, pad)
        hrep_last = jnp.pad(hrep_last, pad)

    def const2(shape):
        # Constant block index -> weight stays resident in VMEM across grid steps.
        return pl.BlockSpec(shape, lambda i: (0, 0))

    drugs, losses = pl.pallas_call(
        _micron_kernel,
        grid=(b_pad // tb,),
        in_specs=[
            pl.BlockSpec((tb, two_e), lambda i: (i, 0)),
            pl.BlockSpec((tb, two_e), lambda i: (i, 0)),
            const2(wh.shape), const2(bh.shape),
            const2(w1.shape), const2(b1.shape),
            const2(w2.shape), const2(b2.shape),
            const2(adj.shape),
        ],
        out_specs=(
            pl.BlockSpec((3, tb, v), lambda i: (0, i, 0)),
            pl.BlockSpec((tb, LOSS_LANES), lambda i: (i, 0)),
        ),
        out_shape=(
            jax.ShapeDtypeStruct((3, b_pad, v), jnp.float32),
            jax.ShapeDtypeStruct((b_pad, LOSS_LANES), jnp.float32),
        ),
        compiler_params=pltpu.CompilerParams(dimension_semantics=("parallel",)),
    )(hrep_cur, hrep_last, wh, bh, w1, b1, w2, b2, adj)

    return drugs[:, :b_total, :], losses[:b_total, 0], losses[:b_total, 1]


# ---------------------------------------------------------------------------
# Jitted batched forward: embedding gather + masked visit sums + Pallas kernel.
# ---------------------------------------------------------------------------
@partial(jax.jit, static_argnames=("tile_b",))
def _micron_forward(embed_diag, embed_proc, wh, bh, w1, b1, w2, b2, adj,
                    dcodes, dmask, pcodes, pmask,
                    ldcodes, ldmask, lpcodes, lpmask, *, tile_b):
    def visit_rep(table, codes, mask):
        emb = jnp.take(table, codes, axis=0)            # (B, L, E)
        return jnp.sum(emb * mask[..., None], axis=1)   # (B, E)

    hrep_cur = jnp.concatenate(
        [visit_rep(embed_diag, dcodes, dmask), visit_rep(embed_proc, pcodes, pmask)],
        axis=-1)                                         # (B, 2E)
    hrep_last = jnp.concatenate(
        [visit_rep(embed_diag, ldcodes, ldmask), visit_rep(embed_proc, lpcodes, lpmask)],
        axis=-1)                                         # (B, 2E); zeros if no last visit
    return micron_heads(hrep_cur, hrep_last, wh, bh, w1, b1, w2, b2, adj,
                        tile_b=tile_b)


class MICRONPallas:
    def __init__(self, vocab_size, ddi_adj, emb_dim=128, key=None, tile_b=8):
        if key is None:
            key = jax.random.PRNGKey(0)
        assert tile_b % 8 == 0
        self.emb_dim = emb_dim
        self.vocab_size = vocab_size
        self.tile_b = tile_b
        ks = jax.random.split(key, 8)

        # init_weights(): embedding weights ~ U(-0.1, 0.1)
        initrange = 0.1
        self.embed = [
            jax.random.uniform(ks[0], (vocab_size[0], emb_dim), jnp.float32,
                               -initrange, initrange),
            jax.random.uniform(ks[1], (vocab_size[1], emb_dim), jnp.float32,
                               -initrange, initrange),
        ]

        # nn.Linear default init, pre-transposed (in, out): y = x @ W + b.
        # Weights in bf16 (MXU operands / halved DMA), biases stay f32.
        def linear_params(kw, kb, fan_in, fan_out):
            bound = 1.0 / (fan_in ** 0.5)
            w = jax.random.uniform(kw, (fan_in, fan_out), jnp.float32, -bound, bound)
            b = jax.random.uniform(kb, (1, fan_out), jnp.float32, -bound, bound)
            return w.astype(jnp.bfloat16), b

        self.Wh, self.bh = linear_params(ks[2], ks[3], 2 * emb_dim, emb_dim)
        self.W1, self.b1 = linear_params(ks[4], ks[5], emb_dim, 4 * emb_dim)
        self.W2, self.b2 = linear_params(ks[6], ks[7], 4 * emb_dim, vocab_size[2])

        self.ddi_adj = jnp.asarray(ddi_adj, jnp.float32)   # 0/1, exact in f32

    def forward_batch(self, dcodes, dmask, pcodes, pmask,
                      ldcodes, ldmask, lpcodes, lpmask):
        """Padded (B, L) code indices + (B, L) f32 masks; last-visit masks all-zero
        for single-visit patients. Returns (drugs (3,B,V), batch_neg (B,), rec_loss (B,))."""
        return _micron_forward(self.embed[0], self.embed[1],
                               self.Wh, self.bh, self.W1, self.b1, self.W2, self.b2,
                               self.ddi_adj,
                               dcodes, dmask, pcodes, pmask,
                               ldcodes, ldmask, lpcodes, lpmask,
                               tile_b=self.tile_b)

    def forward(self, input):
        """torch-like API: `input` is one patient's list of visits (diag_codes, proc_codes)."""
        def pack(codes):
            c = jnp.asarray(codes, jnp.int32).reshape(1, -1)
            return c, jnp.ones(c.shape, jnp.float32)

        dc, dm = pack(input[-1][0])
        pc, pm = pack(input[-1][1])
        if len(input) < 2:          # "* 0.0" branch of the spec -> zero last-visit rep
            ldc, ldm = jnp.zeros((1, 1), jnp.int32), jnp.zeros((1, 1), jnp.float32)
            lpc, lpm = jnp.zeros((1, 1), jnp.int32), jnp.zeros((1, 1), jnp.float32)
        else:
            ldc, ldm = pack(input[-2][0])
            lpc, lpm = pack(input[-2][1])
        drugs, batch_neg, rec_loss = self.forward_batch(dc, dm, pc, pm,
                                                        ldc, ldm, lpc, lpm)
        return (drugs[0, 0:1, :], drugs[1, 0:1, :], drugs[2, 0:1, :],
                batch_neg[0], rec_loss[0])


# ---------------------------------------------------------------------------
# Example run + pure-JAX reference check
# ---------------------------------------------------------------------------
if __name__ == "__main__":
    EMB_DIM = 128
    VOCAB = (30, 40, 128)       # (diag vocab, proc vocab, drug vocab) -- lane-dense V
    B, LD, LP, TB = 16, 6, 5, 8

    key = jax.random.PRNGKey(0)
    (k_model, k_adj, k_dc, k_pc, k_ldc, k_lpc,
     k_dlen, k_plen, k_ldlen, k_lplen) = jax.random.split(key, 10)

    # symmetric 0/1 DDI adjacency, no self loops
    a = (jax.random.uniform(k_adj, (VOCAB[2], VOCAB[2])) < 0.1).astype(jnp.float32)
    a = jnp.triu(a, 1)
    ddi_adj = a + a.T

    model = MICRONPallas(VOCAB, ddi_adj, emb_dim=EMB_DIM, key=k_model, tile_b=TB)

    def make_codes(kc, kl, batch, max_len, vocab):
        codes = jax.random.randint(kc, (batch, max_len), 0, vocab, jnp.int32)
        lens = jax.random.randint(kl, (batch,), 1, max_len + 1)
        mask = (jnp.arange(max_len)[None, :] < lens[:, None]).astype(jnp.float32)
        return codes, mask

    dcodes, dmask = make_codes(k_dc, k_dlen, B, LD, VOCAB[0])
    pcodes, pmask = make_codes(k_pc, k_plen, B, LP, VOCAB[1])
    ldcodes, ldmask = make_codes(k_ldc, k_ldlen, B, LD, VOCAB[0])
    lpcodes, lpmask = make_codes(k_lpc, k_lplen, B, LP, VOCAB[1])
    has_last = (jnp.arange(B) % 2 == 0).astype(jnp.float32)   # odd patients: single visit
    ldmask = ldmask * has_last[:, None]
    lpmask = lpmask * has_last[:, None]

    drugs, batch_neg, rec_loss = model.forward_batch(
        dcodes, dmask, pcodes, pmask, ldcodes, ldmask, lpcodes, lpmask)
    drugs, batch_neg, rec_loss = jax.block_until_ready((drugs, batch_neg, rec_loss))

    # ---- pure-JAX reference (eval-mode dropout), torch-faithful formulas ----
    sig = jax.nn.sigmoid
    V = VOCAB[2]

    def ref_visit_rep(table, codes, mask):
        return jnp.sum(jnp.take(table, codes, axis=0) * mask[:, None],
                       axis=0, keepdims=True)

    def ref_pres(x):
        h = jnp.maximum(jnp.dot(x.astype(jnp.bfloat16), model.W1,
                                preferred_element_type=jnp.float32) + model.b1, 0.0)
        return jnp.dot(h.astype(jnp.bfloat16), model.W2,
                       preferred_element_type=jnp.float32) + model.b2

    def ref_patient(b):
        hc = jnp.concatenate([ref_visit_rep(model.embed[0], dcodes[b], dmask[b]),
                              ref_visit_rep(model.embed[1], pcodes[b], pmask[b])], -1)
        hl = jnp.concatenate([ref_visit_rep(model.embed[0], ldcodes[b], ldmask[b]),
                              ref_visit_rep(model.embed[1], lpcodes[b], lpmask[b])], -1)
        hrc = jnp.dot(hc.astype(jnp.bfloat16), model.Wh,
                      preferred_element_type=jnp.float32) + model.bh
        hrl = jnp.dot(hl.astype(jnp.bfloat16), model.Wh,
                      preferred_element_type=jnp.float32) + model.bh
        r_dr, r_drl, r_drr = ref_pres(hrc), ref_pres(hrl), ref_pres(hrc - hrl)
        s = sig(r_dr)
        r_rl = (1.0 / V) * jnp.sum((s - sig(r_drl + r_drr)) ** 2)
        r_bn = (1.0 / V) * jnp.sum((s.T * s) * model.ddi_adj)
        return r_dr, r_drl, r_drr, r_bn, r_rl

    for b in range(B):
        r_dr, r_drl, r_drr, r_bn, r_rl = ref_patient(b)
        assert jnp.allclose(drugs[0, b], r_dr[0], atol=2e-3, rtol=2e-3)
        assert jnp.allclose(drugs[1, b], r_drl[0], atol=2e-3, rtol=2e-3)
        assert jnp.allclose(drugs[2, b], r_drr[0], atol=2e-3, rtol=2e-3)
        assert jnp.allclose(batch_neg[b], r_bn, atol=5e-3, rtol=5e-3)
        assert jnp.allclose(rec_loss[b], r_rl, atol=1e-4, rtol=1e-2)

    # torch-like single-patient API (patient 0: [last visit, current visit])
    d0 = dcodes[0][dmask[0] > 0]
    p0 = pcodes[0][pmask[0] > 0]
    ld0 = ldcodes[0][ldmask[0] > 0]
    lp0 = lpcodes[0][lpmask[0] > 0]
    single = jax.block_until_ready(model.forward([(ld0, lp0), (d0, p0)]))
    r_dr, _, _, r_bn, r_rl = ref_patient(0)
    assert single[0].shape == (1, V)
    assert jnp.allclose(single[0], r_dr, atol=2e-3, rtol=2e-3)
    assert jnp.allclose(single[3], r_bn, atol=5e-3, rtol=5e-3)
    assert jnp.allclose(single[4], r_rl, atol=1e-4, rtol=1e-2)

    print("KERNEL_OK")
</pallas_src>

<mosaic_0001>
module attributes {stable_mosaic.version = 11 : i64} {
  func.func @_micron_kernel(%arg0: i32, %arg1: memref<8x256xf32, #tpu.memory_space<vmem>>, %arg2: memref<8x256xf32, #tpu.memory_space<vmem>>, %arg3: memref<256x128xbf16, #tpu.memory_space<vmem>>, %arg4: memref<1x128xf32, #tpu.memory_space<vmem>>, %arg5: memref<128x512xbf16, #tpu.memory_space<vmem>>, %arg6: memref<1x512xf32, #tpu.memory_space<vmem>>, %arg7: memref<512x128xbf16, #tpu.memory_space<vmem>>, %arg8: memref<1x128xf32, #tpu.memory_space<vmem>>, %arg9: memref<128x128xf32, #tpu.memory_space<vmem>>, %arg10: memref<3x8x128xf32, #tpu.memory_space<vmem>>, %arg11: memref<8x128xf32, #tpu.memory_space<vmem>>) attributes {dimension_semantics = [#tpu.dimension_semantics<parallel>], iteration_bounds = array<i64: 2>, scalar_prefetch = 0 : i64, scratch_operands = 0 : i64, tpu.core_type = #tpu.core_type<tc>, window_params = [{transform_indices = @transform_0, window_bounds = array<i64: 8, 256>}, {transform_indices = @transform_1, window_bounds = array<i64: 8, 256>}, {pipeline_mode = #tpu.pipeline_mode<synchronous>, transform_indices = @transform_2, window_bounds = array<i64: 256, 128>}, {pipeline_mode = #tpu.pipeline_mode<synchronous>, transform_indices = @transform_3, window_bounds = array<i64: 1, 128>}, {pipeline_mode = #tpu.pipeline_mode<synchronous>, transform_indices = @transform_4, window_bounds = array<i64: 128, 512>}, {pipeline_mode = #tpu.pipeline_mode<synchronous>, transform_indices = @transform_5, window_bounds = array<i64: 1, 512>}, {pipeline_mode = #tpu.pipeline_mode<synchronous>, transform_indices = @transform_6, window_bounds = array<i64: 512, 128>}, {pipeline_mode = #tpu.pipeline_mode<synchronous>, transform_indices = @transform_7, window_bounds = array<i64: 1, 128>}, {pipeline_mode = #tpu.pipeline_mode<synchronous>, transform_indices = @transform_8, window_bounds = array<i64: 128, 128>}, {transform_indices = @transform_9, window_bounds = array<i64: 3, 8, 128>}, {transform_indices = @transform_10, window_bounds = array<i64: 8, 128>}]} {
    %c0 = arith.constant 0 : index
    %c0_0 = arith.constant 0 : index
    %0 = vector.load %arg1[%c0, %c0_0] : memref<8x256xf32, #tpu.memory_space<vmem>>, vector<8x256xf32>
    %c0_1 = arith.constant 0 : index
    %c0_2 = arith.constant 0 : index
    %1 = vector.load %arg2[%c0_1, %c0_2] : memref<8x256xf32, #tpu.memory_space<vmem>>, vector<8x256xf32>
    %2 = tpu.concatenate %0, %1 in 0 : vector<8x256xf32>, vector<8x256xf32> -> vector<16x256xf32>
    %3 = arith.truncf %2 : vector<16x256xf32> to vector<16x256xbf16>
    %c0_3 = arith.constant 0 : index
    %c0_4 = arith.constant 0 : index
    %4 = vector.load %arg3[%c0_3, %c0_4] : memref<256x128xbf16, #tpu.memory_space<vmem>>, vector<256x128xbf16>
    %cst = arith.constant dense<0.000000e+00> : vector<16x128xf32>
    %5 = tpu.matmul %3, %4, %cst {dimension_numbers = #tpu.dot_dimension_numbers<[1], [0], [0], [1], [0, 0, 1, 1], [], []>} : vector<16x256xbf16>, vector<256x128xbf16>, vector<16x128xf32> -> vector<16x128xf32>
    %c0_5 = arith.constant 0 : index
    %c0_6 = arith.constant 0 : index
    %6 = vector.load %arg4[%c0_5, %c0_6] : memref<1x128xf32, #tpu.memory_space<vmem>>, vector<1x128xf32>
    %7 = vector.broadcast %6 : vector<1x128xf32> to vector<16x128xf32>
    %8 = arith.addf %5, %7 : vector<16x128xf32>
    %9 = vector.extract_strided_slice %8 {offsets = [0, 0], sizes = [8, 128], strides = [1, 1]} : vector<16x128xf32> to vector<8x128xf32>
    %10 = vector.extract_strided_slice %8 {offsets = [8, 0], sizes = [8, 128], strides = [1, 1]} : vector<16x128xf32> to vector<8x128xf32>
    %11 = arith.subf %9, %10 : vector<8x128xf32>
    %12 = tpu.concatenate %9, %10, %11 in 0 : vector<8x128xf32>, vector<8x128xf32>, vector<8x128xf32> -> vector<24x128xf32>
    %13 = arith.truncf %12 : vector<24x128xf32> to vector<24x128xbf16>
    %c0_7 = arith.constant 0 : index
    %c0_8 = arith.constant 0 : index
    %14 = vector.load %arg5[%c0_7, %c0_8] : memref<128x512xbf16, #tpu.memory_space<vmem>>, vector<128x512xbf16>
    %cst_9 = arith.constant dense<0.000000e+00> : vector<24x512xf32>
    %15 = tpu.matmul %13, %14, %cst_9 {dimension_numbers = #tpu.dot_dimension_numbers<[1], [0], [0], [1], [0, 0, 1, 1], [], []>} : vector<24x128xbf16>, vector<128x512xbf16>, vector<24x512xf32> -> vector<24x512xf32>
    %c0_10 = arith.constant 0 : index
    %c0_11 = arith.constant 0 : index
    %16 = vector.load %arg6[%c0_10, %c0_11] : memref<1x512xf32, #tpu.memory_space<vmem>>, vector<1x512xf32>
    %17 = vector.broadcast %16 : vector<1x512xf32> to vector<24x512xf32>
    %18 = arith.addf %15, %17 : vector<24x512xf32>
    %cst_12 = arith.constant 0.000000e+00 : f32
    %19 = vector.broadcast %cst_12 : f32 to vector<24x512xf32>
    %20 = arith.maximumf %18, %19 : vector<24x512xf32>
    %21 = arith.truncf %20 : vector<24x512xf32> to vector<24x512xbf16>
    %c0_13 = arith.constant 0 : index
    %c0_14 = arith.constant 0 : index
    %22 = vector.load %arg7[%c0_13, %c0_14] : memref<512x128xbf16, #tpu.memory_space<vmem>>, vector<512x128xbf16>
    %cst_15 = arith.constant dense<0.000000e+00> : vector<24x128xf32>
    %23 = tpu.matmul %21, %22, %cst_15 {dimension_numbers = #tpu.dot_dimension_numbers<[1], [0], [0], [1], [0, 0, 1, 1], [], []>} : vector<24x512xbf16>, vector<512x128xbf16>, vector<24x128xf32> -> vector<24x128xf32>
    %c0_16 = arith.constant 0 : index
    %c0_17 = arith.constant 0 : index
    %24 = vector.load %arg8[%c0_16, %c0_17] : memref<1x128xf32, #tpu.memory_space<vmem>>, vector<1x128xf32>
    %25 = vector.broadcast %24 : vector<1x128xf32> to vector<24x128xf32>
    %26 = arith.addf %23, %25 : vector<24x128xf32>
    %27 = vector.extract_strided_slice %26 {offsets = [0, 0], sizes = [8, 128], strides = [1, 1]} : vector<24x128xf32> to vector<8x128xf32>
    %28 = vector.extract_strided_slice %26 {offsets = [8, 0], sizes = [8, 128], strides = [1, 1]} : vector<24x128xf32> to vector<8x128xf32>
    %29 = vector.extract_strided_slice %26 {offsets = [16, 0], sizes = [8, 128], strides = [1, 1]} : vector<24x128xf32> to vector<8x128xf32>
    %c0_18 = arith.constant 0 : index
    %c0_19 = arith.constant 0 : index
    %c0_20 = arith.constant 0 : index
    %30 = vector.load %arg10[%c0_18, %c0_19, %c0_20] : memref<3x8x128xf32, #tpu.memory_space<vmem>>, vector<1x8x128xf32>
    %31 = vector.shape_cast %30 : vector<1x8x128xf32> to vector<8x128xf32>
    %32 = vector.shape_cast %27 : vector<8x128xf32> to vector<1x8x128xf32>
    tpu.vector_store %arg10[%c0_18, %c0_19, %c0_20], %32 {strides = array<i32>} : memref<3x8x128xf32, #tpu.memory_space<vmem>>, vector<1x8x128xf32>,
    %c1 = arith.constant 1 : index
    %c0_21 = arith.constant 0 : index
    %c0_22 = arith.constant 0 : index
    %33 = vector.load %arg10[%c1, %c0_21, %c0_22] : memref<3x8x128xf32, #tpu.memory_space<vmem>>, vector<1x8x128xf32>
    %34 = vector.shape_cast %33 : vector<1x8x128xf32> to vector<8x128xf32>
    %35 = vector.shape_cast %28 : vector<8x128xf32> to vector<1x8x128xf32>
    tpu.vector_store %arg10[%c1, %c0_21, %c0_22], %35 {strides = array<i32>} : memref<3x8x128xf32, #tpu.memory_space<vmem>>, vector<1x8x128xf32>,
    %c2 = arith.constant 2 : index
    %c0_23 = arith.constant 0 : index
    %c0_24 = arith.constant 0 : index
    %36 = vector.load %arg10[%c2, %c0_23, %c0_24] : memref<3x8x128xf32, #tpu.memory_space<vmem>>, vector<1x8x128xf32>
    %37 = vector.shape_cast %36 : vector<1x8x128xf32> to vector<8x128xf32>
    %38 = vector.shape_cast %29 : vector<8x128xf32> to vector<1x8x128xf32>
    tpu.vector_store %arg10[%c2, %c0_23, %c0_24], %38 {strides = array<i32>} : memref<3x8x128xf32, #tpu.memory_space<vmem>>, vector<1x8x128xf32>,
    %cst_25 = arith.constant 0.000000e+00 : f32
    %39 = vector.broadcast %cst_25 : f32 to vector<8x128xf32>
    %40 = arith.subf %39, %27 : vector<8x128xf32>
    %41 = math.exp %40 : vector<8x128xf32>
    %cst_26 = arith.constant 1.000000e+00 : f32
    %42 = vector.broadcast %cst_26 : f32 to vector<8x128xf32>
    %43 = arith.addf %42, %41 : vector<8x128xf32>
    %44 = tpu.reciprocal %43 : vector<8x128xf32> -> vector<8x128xf32>
    %45 = arith.addf %28, %29 : vector<8x128xf32>
    %cst_27 = arith.constant 0.000000e+00 : f32
    %46 = vector.broadcast %cst_27 : f32 to vector<8x128xf32>
    %47 = arith.subf %46, %45 : vector<8x128xf32>
    %48 = math.exp %47 : vector<8x128xf32>
    %cst_28 = arith.constant 1.000000e+00 : f32
    %49 = vector.broadcast %cst_28 : f32 to vector<8x128xf32>
    %50 = arith.addf %49, %48 : vector<8x128xf32>
    %51 = tpu.reciprocal %50 : vector<8x128xf32> -> vector<8x128xf32>
    %52 = arith.subf %44, %51 : vector<8x128xf32>
    %53 = arith.mulf %52, %52 : vector<8x128xf32>
    %cst_29 = arith.constant dense<0.000000e+00> : vector<8xf32>
    %54 = vector.multi_reduction <add>, %53, %cst_29 [1] : vector<8x128xf32> to vector<8xf32>
    %55 = vector.shape_cast %54 : vector<8xf32> to vector<8x1xf32>
    %cst_30 = arith.constant 7.812500e-03 : f32
    %56 = vector.broadcast %cst_30 : f32 to vector<8x1xf32>
    %57 = arith.mulf %56, %55 : vector<8x1xf32>
    %c0_31 = arith.constant 0 : index
    %c0_32 = arith.constant 0 : index
    %58 = vector.load %arg9[%c0_31, %c0_32] : memref<128x128xf32, #tpu.memory_space<vmem>>, vector<128x128xf32>
    %cst_33 = arith.constant dense<0.000000e+00> : vector<8x128xf32>
    %59 = tpu.matmul %44, %58, %cst_33 {dimension_numbers = #tpu.dot_dimension_numbers<[1], [0], [0], [1], [0, 0, 1, 1], [], []>} : vector<8x128xf32>, vector<128x128xf32>, vector<8x128xf32> -> vector<8x128xf32>
    %60 = arith.mulf %59, %44 : vector<8x128xf32>
    %cst_34 = arith.constant dense<0.000000e+00> : vector<8xf32>
    %61 = vector.multi_reduction <add>, %60, %cst_34 [1] : vector<8x128xf32> to vector<8xf32>
    %62 = vector.shape_cast %61 : vector<8xf32> to vector<8x1xf32>
    %cst_35 = arith.constant 7.812500e-03 : f32
    %63 = vector.broadcast %cst_35 : f32 to vector<8x1xf32>
    %64 = arith.mulf %63, %62 : vector<8x1xf32>
    %65 = tpu.iota {dimensions = array<i32: 1>} : vector<8x128xi32>
    %c0_i32 = arith.constant 0 : i32
    %66 = vector.broadcast %c0_i32 : i32 to vector<8x128xi32>
    %67 = arith.cmpi eq, %65, %66 : vector<8x128xi32>
    %cst_36 = arith.constant 0.000000e+00 : f32
    %68 = vector.shape_cast %64 : vector<8x1xf32> to vector<8x1xf32>
    %69 = vector.broadcast %68 : vector<8x1xf32> to vector<8x128xf32>
    %70 = vector.broadcast %cst_36 : f32 to vector<8x128xf32>
    %71 = arith.select %67, %69, %70 : vector<8x128xi1>, vector<8x128xf32>
    %c1_i32 = arith.constant 1 : i32
    %72 = vector.broadcast %c1_i32 : i32 to vector<8x128xi32>
    %73 = arith.cmpi eq, %65, %72 : vector<8x128xi32>
    %cst_37 = arith.constant 0.000000e+00 : f32
    %74 = vector.shape_cast %57 : vector<8x1xf32> to vector<8x1xf32>
    %75 = vector.broadcast %74 : vector<8x1xf32> to vector<8x128xf32>
    %76 = vector.broadcast %cst_37 : f32 to vector<8x128xf32>
    %77 = arith.select %73, %75, %76 : vector<8x128xi1>, vector<8x128xf32>
    %78 = arith.addf %71, %77 : vector<8x128xf32>
    %c0_38 = arith.constant 0 : index
    %c0_39 = arith.constant 0 : index
    %79 = vector.load %arg11[%c0_38, %c0_39] : memref<8x128xf32, #tpu.memory_space<vmem>>, vector<8x128xf32>
    tpu.vector_store %arg11[%c0_38, %c0_39], %78 {strides = array<i32>} : memref<8x128xf32, #tpu.memory_space<vmem>>, vector<8x128xf32>,
    return
  }
  func.func @transform_0(%arg0: i32) -> (i32, i32) {
    %c0_i32 = arith.constant 0 : i32
    %c0_i32_0 = arith.constant 0 : i32
    return %arg0, %c0_i32 : i32, i32
  }
  func.func @transform_1(%arg0: i32) -> (i32, i32) {
    %c0_i32 = arith.constant 0 : i32
    %c0_i32_0 = arith.constant 0 : i32
    return %arg0, %c0_i32 : i32, i32
  }
  func.func @transform_2(%arg0: i32) -> (i32, i32) {
    %c0_i32 = arith.constant 0 : i32
    %c0_i32_0 = arith.constant 0 : i32
    %c0_i32_1 = arith.constant 0 : i32
    return %c0_i32, %c0_i32_0 : i32, i32
  }
  func.func @transform_3(%arg0: i32) -> (i32, i32) {
    %c0_i32 = arith.constant 0 : i32
    %c0_i32_0 = arith.constant 0 : i32
    %c0_i32_1 = arith.constant 0 : i32
    return %c0_i32, %c0_i32_0 : i32, i32
  }
  func.func @transform_4(%arg0: i32) -> (i32, i32) {
    %c0_i32 = arith.constant 0 : i32
    %c0_i32_0 = arith.constant 0 : i32
    %c0_i32_1 = arith.constant 0 : i32
    return %c0_i32, %c0_i32_0 : i32, i32
  }
  func.func @transform_5(%arg0: i32) -> (i32, i32) {
    %c0_i32 = arith.constant 0 : i32
    %c0_i32_0 = arith.constant 0 : i32
    %c0_i32_1 = arith.constant 0 : i32
    return %c0_i32, %c0_i32_0 : i32, i32
  }
  func.func @transform_6(%arg0: i32) -> (i32, i32) {
    %c0_i32 = arith.constant 0 : i32
    %c0_i32_0 = arith.constant 0 : i32
    %c0_i32_1 = arith.constant 0 : i32
    return %c0_i32, %c0_i32_0 : i32, i32
  }
  func.func @transform_7(%arg0: i32) -> (i32, i32) {
    %c0_i32 = arith.constant 0 : i32
    %c0_i32_0 = arith.constant 0 : i32
    %c0_i32_1 = arith.constant 0 : i32
    return %c0_i32, %c0_i32_0 : i32, i32
  }
  func.func @transform_8(%arg0: i32) -> (i32, i32) {
    %c0_i32 = arith.constant 0 : i32
    %c0_i32_0 = arith.constant 0 : i32
    %c0_i32_1 = arith.constant 0 : i32
    return %c0_i32, %c0_i32_0 : i32, i32
  }
  func.func @transform_9(%arg0: i32) -> (i32, i32, i32) {
    %c0_i32 = arith.constant 0 : i32
    %c0_i32_0 = arith.constant 0 : i32
    %c0_i32_1 = arith.constant 0 : i32
    return %c0_i32, %arg0, %c0_i32_0 : i32, i32, i32
  }
  func.func @transform_10(%arg0: i32) -> (i32, i32) {
    %c0_i32 = arith.constant 0 : i32
    %c0_i32_0 = arith.constant 0 : i32
    return %arg0, %c0_i32 : i32, i32
  }
}

</mosaic_0001>

<bundles_post_ra>
// kernel: _micron_forward.1
= control target key start
LH: loop header
LB: loop body
LE: loop exit
PB: predicated region body
PF: predicated region fallthrough
CT: control target
= control target key end

     0   :  { %16 = vsyncpa [#allocation3], 0  ;;  %s2510_s0 = inlined_call_operand.vmem [shape: f32[16,256], index: 0, kind: input, shape index: {}]   ;;  %s2511_s1 = inlined_call_operand.vmem [shape: f32[16,256], index: 1, kind: input, shape index: {}]   ;;  %s2512_s2 = inlined_call_operand.vmem [shape: bf16[256,128], index: 2, kind: input, shape index: {}]   ;;  %s2513_s3 = inlined_call_operand.vmem [shape: f32[1,128], index: 3, kind: input, shape index: {}]   ;;  %s2514_s4 = inlined_call_operand.vmem [shape: bf16[128,512], index: 4, kind: input, shape index: {}]   ;;  %s2515_s5 = inlined_call_operand.vmem [shape: f32[1,512], index: 5, kind: input, shape index: {}]   ;;  %s2516_s6 = inlined_call_operand.vmem [shape: bf16[512,128], index: 6, kind: input, shape index: {}]   ;;  %s2517_s7 = inlined_call_operand.vmem [shape: f32[1,128], index: 7, kind: input, shape index: {}]   ;;  %s2518_s8 = inlined_call_operand.vmem [shape: f32[128,128], index: 8, kind: input, shape index: {}]   ;;  %s2519_s9 = inlined_call_operand.hbm [shape: f32[3,16,128], index: 9, kind: output, shape index: {0}]   ;;  %s2520_s10 = inlined_call_operand.vmem [shape: f32[16,128], index: 10, kind: output, shape index: {1}]  }
   0x1   :  { %18 = vsyncpa [#allocation3 + $0x1], 0  ;;  %s1998_s13 = smov 0   ;;  %s2000_s14 = smov 0  }
   0x2   :  { %s2002_s15 = smov 0   ;;  %s2004_s16 = smov 0  }
   0x3 LB: > { %2525 = sst [smem:[#allocation5_spill]] %s1934_s15  ;;  %s2019_s17 = sadd.s32 4294967295, %s1938_s16   ;;  %s1938_s16 = sphi %s2004_s16, %s2532_s16   ;;  %s1934_s15 = sphi %s2002_s15, %s2534_s15   ;;  %s1930_s14 = sphi %s2000_s14, %s2536_s14   ;;  %s1926_s13 = sphi %s1998_s13, %s2535_s13  }
   0x4   : > { %s1399_s18 = sadd.s32 4294967294, %s1938_s16   ;;  %s2023_s19 = sadd.s32 1, %s1938_s16  }
   0x5   : > { %2526 = sst [smem:[#allocation6_spill]] %s2023_s19  ;;  %s230_s20 = sadd.s32 1, %s1934_s15 }
   0x6   : > { %s227_s21 = ssub.s32 %s1938_s16, %s2023_s19  ;;  %p240_p0 = scmp.ne.s32.totalorder %s1934_s15, %s1930_s14 }
   0x7   : > { %p228_p1 = scmp.eq.s32.totalorder %s227_s21, 0  ;;  %p241_p2 = scmp.eq.s32.totalorder %s2019_s17, 1 }
   0x8   : > { %p246_p3 = scmp.ne.s32.totalorder %s1930_s14, %s1926_s13  ;;  %p247_p4 = scmp.eq.s32.totalorder %s1399_s18, 1 }
   0x9   : > { %s2034_s22 = scalar_select %p228_p1, %s1934_s15, %s230_s20  }
   0xa   : > { %p2036_p5 = por %p241_p2, %p240_p0  ;;  %p2040_p6 = por %p247_p4, %p246_p3 }
   0xb   : > { %2527 = sst [smem:[#allocation7_spill]] %s2034_s22  ;;  %p1402_p7 = scmp.ge.s32.totalorder %s1938_s16, 1 }
   0xc   : > { %s2529_s24 = scalar_select %p2040_p6, 1, 0 }
   0xd   : > { %p328_p8 = scmp.lt.s32.totalorder %s1938_s16, 3 }
   0xe   : > { %2530 = sst [smem:[#allocation8_spill]] %s2529_s24 }
   0xf   : > { %p329_p9 = pnand %p1402_p7, %p328_p8 }
  0x10   : > { %p375_p10 = scmp.lt.s32.totalorder (!%p329_p9), %s2019_s17, 1  ;;  %s366_s26 = sand.u32 (!%p329_p9), 1, %s1930_s14  }
  0x11   : > { %332 = sbr.rel (%p329_p9) target bundleno = 766 (0x2fe), region = 56  ;;  %s1280_s30 = scalar_lea.sflag (!%p329_p9), [#allocation3], %s366_s26 }
  0x12   : > { %s1823_s29 = smul.u32 (!%p329_p9), 24, %s366_s26 }
  0x14   : > { %s2467_s20 = scalar_lea.vmem (!%p329_p9), [#allocation2], %s1823_s29 }
  0x15   : > { %s1295_s25 = sshll.u32 (!%p329_p9), %s2467_s20, 4  ;;  %s1296_s25 = int_to_ptr.vmem [resolvable:$true] %s1295_s25 }
  0x16   : > { %v1742_v0 = vld [vmem:[%s2512_s2 + $0x38] sm:$0xff]  ;;  %v1741_v2 = vld [vmem:[%s2512_s2 + $0x30] sm:$0xff]  ;;  %v1586_v4 = vld [vmem:[%s2514_s4 + $0xe0] sm:$0xf]  ;;  %s2119_s27 = scalar_select %p375_p10, %s2019_s17, 1 }
  0x17   : > { %v1750_v1 = vld [vmem:[%s2512_s2 + $0x78] sm:$0xff]  ;;  %527 = vmatpush.bf16.msra.mxu0 %v1742_v0  ;;  %v1749_v3 = vld [vmem:[%s2512_s2 + $0x70] sm:$0xff]  ;;  %v1740_v6 = vld [vmem:[%s2512_s2 + $0x28] sm:$0xff] }
  0x18   : > { %541 = vmatpush.bf16.msra.mxu1 %v1750_v1  ;;  %v1781_v5 = vld [vmem:[%s2514_s4 + $0xec] sm:$0xf0]  ;;  %v1748_v7 = vld [vmem:[%s2512_s2 + $0x68] sm:$0xff]  ;;  %v1779_v9 = vld [vmem:[%s2514_s4 + $0xe4] sm:$0xf]  ;;  %s1733_s28 = sshll.u32 %s2119_s27, 4 }
  0x19   : > { %v1587_v8 = vor.u32 %v1781_v5, %v1586_v4  ;;  %v1588_v10 = vld [vmem:[%s2514_s4 + $0xf0] sm:$0xf0]  ;;  %v1739_v12 = vld [vmem:[%s2512_s2 + $0x20] sm:$0xff]  ;;  %v1777_v14 = vld [vmem:[%s2514_s4 + $0xcc] sm:$0xf0]  ;;  %s379_s21 = scalar_lea.vmem %s2510_s0, %s1733_s28  ;;  %s384_s22 = scalar_lea.vmem %s2511_s1, %s1733_s28 }
  0x1a   : > { %v1591_v11 = vor.u32 %v1779_v9, %v1588_v10  ;;  %v1570_v13 = vld [vmem:[%s2514_s4 + $0xc0] sm:$0xf]  ;;  %v1775_v17 = vld [vmem:[%s2514_s4 + $0xc4] sm:$0xf]  ;;  %v1572_v18 = vld [vmem:[%s2514_s4 + $0xd0] sm:$0xf0] }
  0x1b   : > { %528 = vmatpush.bf16.msra.mxu0 %v1741_v2  ;;  %760 = vmatpush.bf16.msra.mxu2 %v1587_v8  ;;  %v1747_v15 = vld [vmem:[%s2512_s2 + $0x60] sm:$0xff]  ;;  %v1571_v16 = vor.u32 %v1777_v14, %v1570_v13  ;;  %v1575_v19 = vor.u32 %v1775_v17, %v1572_v18  ;;  %v1773_v21 = vld [vmem:[%s2514_s4 + $0xac] sm:$0xf0]  ;;  %v1556_v24 = vld [vmem:[%s2514_s4 + $0xb0] sm:$0xf0]  ;;  %s1730_s28 = sshll.u32 %s2019_s17, 3 }
  0x1c   : > { %542 = vmatpush.bf16.msra.mxu1 %v1749_v3  ;;  %778 = vmatpush.bf16.msra.mxu3 %v1591_v11  ;;  %v1554_v20 = vld [vmem:[%s2514_s4 + $0xa0] sm:$0xf]  ;;  %v1771_v22 = vld [vmem:[%s2514_s4 + $0xa4] sm:$0xf]  ;;  %v1738_v25 = vld [vmem:[%s2512_s2 + $0x18] sm:$0xff]  ;;  %s1294_s24 = scalar_lea.hbm %s2519_s9, %s1730_s28  ;;  %s1896_s17 = scalar_lea.hbm %s2519_s9, 48 }
  0x1d   : > { %v1555_v23 = vor.u32 %v1773_v21, %v1554_v20  ;;  %v1746_v26 = vld [vmem:[%s2512_s2 + $0x58] sm:$0xff]  ;;  %v1538_v27 = vld [vmem:[%s2514_s4 + $0x80] sm:$0xf]  ;;  %v1559_v28 = vor.u32 %v1771_v22, %v1556_v24  ;;  %v1769_v29 = vld [vmem:[%s2514_s4 + $0x8c] sm:$0xf0]  ;;  %s1297_s29 = sshll.u32 %s1294_s24, 4  ;;  %s1298_s29 = int_to_ptr.hbm [resolvable:$true] %s1297_s29 }
  0x1e   : > { %v1539_v30 = vor.u32 %v1769_v29, %v1538_v27  ;;  %v1767_v31 = vld [vmem:[%s2514_s4 + $0x84] sm:$0xf]  ;;  %v1540_v32 = vld [vmem:[%s2514_s4 + $0x90] sm:$0xf0]  ;;  %v1736_v36 = vld [vmem:[%s2512_s2 + $0x8] sm:$0xff]  ;;  %s1890_s11 = sshra.s32 %s1298_s29, 4  ;;  %s1891_s11 = int_to_ptr.hbm [resolvable:$true] %s1890_s11 }
  0x1f   : > { %529 = vmatpush.bf16.msra.mxu0 %v1740_v6  ;;  %761 = vmatpush.bf16.msra.mxu2 %v1571_v16  ;;  %v1737_v33 = vld [vmem:[%s2512_s2 + $0x10] sm:$0xff]  ;;  %v1543_v35 = vor.u32 %v1767_v31, %v1540_v32  ;;  %v1744_v37 = vld [vmem:[%s2512_s2 + $0x48] sm:$0xff]  ;;  %v1782_v39 = vld [vmem:[%s2514_s4 + $0xf4] sm:$0xf0]  ;;  %s1892_s12 = scalar_lea.hbm %s1891_s11, 24  ;;  %p1897_p0 = scmp.lt.s32.totalorder %s1891_s11, %s2519_s9 }
  0x20   : > { %543 = vmatpush.bf16.msra.mxu1 %v1748_v7  ;;  %779 = vmatpush.bf16.msra.mxu3 %v1575_v19  ;;  %v1745_v34 = vld [vmem:[%s2512_s2 + $0x50] sm:$0xff]  ;;  %v1594_v38 = vld [vmem:[%s2514_s4 + $0xe8] sm:$0xf]  ;;  %v1780_v40 = vld [vmem:[%s2514_s4 + $0xec] sm:$0xf]  ;;  %p1893_p11 = scmp.ne.s32.totalorder %s1891_s11, %s1892_s12  ;;  %p1898_p1 = scmp.lt.s32.totalorder %s1896_s17, %s1892_s12 }
  0x21   : > { %v1596_v41 = vld [vmem:[%s2514_s4 + $0xf8] sm:$0xf0]  ;;  %v1735_v42 = vld [vmem:[%s2512_s2] sm:$0xff]  ;;  %v390_v46 = vld [vmem:[%s379_s21 + $0x8] sm:$0xff]  ;;  %v1595_v48 = vor.u32 %v1782_v39, %v1594_v38 }
  0x22   : > { %v1743_v43 = vld [vmem:[%s2512_s2 + $0x40] sm:$0xff]  ;;  %v392_v47 = vld [vmem:[%s384_s22 + $0x8] sm:$0xff]  ;;  %v1599_v49 = vor.u32 %v1780_v40, %v1596_v41  ;;  %v1778_v51 = vld [vmem:[%s2514_s4 + $0xd4] sm:$0xf0]  ;;  %p1894_p12 = pnand %p1893_p11, %p2036_p5  ;;  %p1899_p2 = por %p1898_p1, %p1897_p0 }
  0x23   : > { %530 = vmatpush.bf16.msra.mxu0 %v1739_v12  ;;  %762 = vmatpush.bf16.msra.mxu2 %v1555_v23  ;;  %v389_v44 = vld [vmem:[%s379_s21] sm:$0xff]  ;;  %v1578_v50 = vld [vmem:[%s2514_s4 + $0xc8] sm:$0xf]  ;;  %v1776_v52 = vld [vmem:[%s2514_s4 + $0xcc] sm:$0xf]  ;;  %v394_v55 = vpack.c.bf16 %v392_v47, %v390_v46 }
  0x24   : > { %544 = vmatpush.bf16.msra.mxu1 %v1747_v15  ;;  %780 = vmatpush.bf16.msra.mxu3 %v1559_v28  ;;  %v391_v45 = vld [vmem:[%s384_s22] sm:$0xff]  ;;  %v1580_v53 = vld [vmem:[%s2514_s4 + $0xd8] sm:$0xf0]  ;;  %v1579_v56 = vor.u32 %v1778_v51, %v1578_v50  ;;  %v1562_v58 = vld [vmem:[%s2514_s4 + $0xa8] sm:$0xf]  ;;  %p1895_p13 = pneg %p1894_p12 }
  0x25   : > { %v393_v54 = vpack.c.bf16 %v391_v45, %v389_v44  ;;  %v1583_v57 = vor.u32 %v1776_v52, %v1580_v53  ;;  %v1774_v59 = vld [vmem:[%s2514_s4 + $0xb4] sm:$0xf0]  ;;  %v1772_v60 = vld [vmem:[%s2514_s4 + $0xac] sm:$0xf]  ;;  %v1564_v61 = vld [vmem:[%s2514_s4 + $0xb8] sm:$0xf0] }
  0x26   : > { %v1563_v62 = vor.u32 %v1774_v59, %v1562_v58  ;;  %v1567_v63 = vor.u32 %v1772_v60, %v1564_v61  ;;  %v1546_v0 = vld [vmem:[%s2514_s4 + $0x88] sm:$0xf]  ;;  %v1770_v1 = vld [vmem:[%s2514_s4 + $0x94] sm:$0xf0]  ;;  %v1768_v2 = vld [vmem:[%s2514_s4 + $0x8c] sm:$0xf]  ;;  %p1900_p3 = pnand %p1899_p2, %p1895_p13 }
  0x27   : > { %531 = vmatpush.bf16.msra.mxu0 %v1738_v25  ;;  %763 = vmatpush.bf16.msra.mxu2 %v1539_v30  ;;  %v1548_v3 = vld [vmem:[%s2514_s4 + $0x98] sm:$0xf0]  ;;  %v1547_v4 = vor.u32 %v1770_v1, %v1546_v0  ;;  %v1522_v6 = vld [vmem:[%s2514_s4 + $0x60] sm:$0xf]  ;;  %v1765_v7 = vld [vmem:[%s2514_s4 + $0x6c] sm:$0xf0] }
  0x28   : > { %545 = vmatpush.bf16.msra.mxu1 %v1746_v26  ;;  %781 = vmatpush.bf16.msra.mxu3 %v1543_v35  ;;  %v1551_v5 = vor.u32 %v1768_v2, %v1548_v3  ;;  %v1763_v8 = vld [vmem:[%s2514_s4 + $0x64] sm:$0xf]  ;;  %v1523_v9 = vor.u32 %v1765_v7, %v1522_v6  ;;  %v1524_v10 = vld [vmem:[%s2514_s4 + $0x70] sm:$0xf0]  ;;  %v1530_v11 = vld [vmem:[%s2514_s4 + $0x68] sm:$0xf] }
  0x29   : > { %v1766_v12 = vld [vmem:[%s2514_s4 + $0x74] sm:$0xf0]  ;;  %v1527_v13 = vor.u32 %v1763_v8, %v1524_v10  ;;  %v1764_v15 = vld [vmem:[%s2514_s4 + $0x6c] sm:$0xf]  ;;  %v1532_v16 = vld [vmem:[%s2514_s4 + $0x78] sm:$0xf0] }
  0x2a   : > { %v1531_v14 = vor.u32 %v1766_v12, %v1530_v11  ;;  %v1535_v17 = vor.u32 %v1764_v15, %v1532_v16  ;;  %v1506_v18 = vld [vmem:[%s2514_s4 + $0x40] sm:$0xf]  ;;  %v1761_v19 = vld [vmem:[%s2514_s4 + $0x4c] sm:$0xf0]  ;;  %v1759_v20 = vld [vmem:[%s2514_s4 + $0x44] sm:$0xf] }
  0x2b   : > { %532 = vmatpush.bf16.msra.mxu0 %v1737_v33  ;;  %764 = vmatpush.bf16.msra.mxu2 %v1523_v9  ;;  %v1507_v21 = vor.u32 %v1761_v19, %v1506_v18  ;;  %v1508_v22 = vld [vmem:[%s2514_s4 + $0x50] sm:$0xf0]  ;;  %v1514_v23 = vld [vmem:[%s2514_s4 + $0x48] sm:$0xf]  ;;  %v1762_v24 = vld [vmem:[%s2514_s4 + $0x54] sm:$0xf0] }
  0x2c   : > { %546 = vmatpush.bf16.msra.mxu1 %v1745_v34  ;;  %782 = vmatpush.bf16.msra.mxu3 %v1527_v13  ;;  %v1511_v25 = vor.u32 %v1759_v20, %v1508_v22  ;;  %v1515_v26 = vor.u32 %v1762_v24, %v1514_v23  ;;  %v1760_v27 = vld [vmem:[%s2514_s4 + $0x4c] sm:$0xf]  ;;  %v1516_v28 = vld [vmem:[%s2514_s4 + $0x58] sm:$0xf0]  ;;  %v1490_v30 = vld [vmem:[%s2514_s4 + $0x20] sm:$0xf] }
  0x2d   : > { %v1519_v29 = vor.u32 %v1760_v27, %v1516_v28  ;;  %v1757_v31 = vld [vmem:[%s2514_s4 + $0x2c] sm:$0xf0]  ;;  %v1755_v32 = vld [vmem:[%s2514_s4 + $0x24] sm:$0xf]  ;;  %v1492_v34 = vld [vmem:[%s2514_s4 + $0x30] sm:$0xf0] }
  0x2e   : > { %v1491_v33 = vor.u32 %v1757_v31, %v1490_v30  ;;  %v1498_v35 = vld [vmem:[%s2514_s4 + $0x28] sm:$0xf]  ;;  %v1756_v39 = vld [vmem:[%s2514_s4 + $0x2c] sm:$0xf]  ;;  %v1500_v40 = vld [vmem:[%s2514_s4 + $0x38] sm:$0xf0] }
  0x2f   : > { %533 = vmatpush.bf16.msra.mxu0 %v1736_v36  ;;  %765 = vmatpush.bf16.msra.mxu2 %v1507_v21  ;;  %v1758_v36 = vld [vmem:[%s2514_s4 + $0x34] sm:$0xf0]  ;;  %v1503_v41 = vor.u32 %v1756_v39, %v1500_v40  ;;  %v1751_v44 = vld [vmem:[%s2514_s4 + $0x4] sm:$0xf]  ;;  %v1476_v46 = vld [vmem:[%s2514_s4 + $0x10] sm:$0xf0] }
  0x30   : > { %547 = vmatpush.bf16.msra.mxu1 %v1744_v37  ;;  %783 = vmatpush.bf16.msra.mxu3 %v1511_v25  ;;  %v1495_v37 = vor.u32 %v1755_v32, %v1492_v34  ;;  %v1499_v38 = vor.u32 %v1758_v36, %v1498_v35  ;;  %v1482_v47 = vld [vmem:[%s2514_s4 + $0x8] sm:$0xf]  ;;  %v1752_v51 = vld [vmem:[%s2514_s4 + $0xc] sm:$0xf]  ;;  %v1484_v52 = vld [vmem:[%s2514_s4 + $0x18] sm:$0xf0] }
  0x31   : > { %v1487_v53 = vor.u32 %v1752_v51, %v1484_v52  ;;  %v1790_v58 = vld [vmem:[%s2516_s6 + $0x38] sm:$0xff]  ;;  %v2317_v60 = vld [vmem:[%s2516_s6 + $0xb0] sm:$0xff]  ;;  %v2335_v1 = vld [vmem:[%s2516_s6 + $0xa8] sm:$0xff] }
  0x32   : > { %v1798_v59 = vld [vmem:[%s2516_s6 + $0x78] sm:$0xff]  ;;  %v1813_v61 = vld [vmem:[%s2516_s6 + $0xf0] sm:$0xff]  ;;  %v1812_v2 = vld [vmem:[%s2516_s6 + $0xe8] sm:$0xff] }
  0x33   : > { %534 = vmatpush.bf16.msra.mxu0 %v1735_v42  ;;  %766 = vmatpush.bf16.msra.mxu2 %v1491_v33  ;;  %v1474_v42 = vld [vmem:[%s2514_s4] sm:$0xf]  ;;  %v1797_v0 = vld [vmem:[%s2516_s6 + $0x70] sm:$0xff]  ;;  %v1802_v16 = vld [vmem:[%s2516_s6 + $0x98] sm:$0xff] }
  0x34   : > { %548 = vmatpush.bf16.msra.mxu1 %v1743_v43  ;;  %784 = vmatpush.bf16.msra.mxu3 %v1495_v37  ;;  %v1753_v43 = vld [vmem:[%s2514_s4 + $0xc] sm:$0xf0]  ;;  %v1803_v9 = vld [vmem:[%s2516_s6 + $0xa0] sm:$0xff]  ;;  %v1786_v22 = vld [vmem:[%s2516_s6 + $0x18] sm:$0xff] }
  0x35   : > { %v1475_v45 = vor.u32 %v1753_v43, %v1474_v42  ;;  %v1811_v10 = vld [vmem:[%s2516_s6 + $0xe0] sm:$0xff]  ;;  %v1801_v20 = vld [vmem:[%s2516_s6 + $0x90] sm:$0xff]  ;;  %v1794_v23 = vld [vmem:[%s2516_s6 + $0x58] sm:$0xff] }
  0x36   : > { %535 = vmatmul.bf16.vlgmr.msra.gmra.mxu0 %v393_v54  ;;  %v1787_v18 = vld [vmem:[%s2516_s6 + $0x20] sm:$0xff]  ;;  %v1809_v21 = vld [vmem:[%s2516_s6 + $0xd0] sm:$0xff]  ;;  %v1800_v24 = vld [vmem:[%s2516_s6 + $0x88] sm:$0xff] }
  0x37   : > { %796 = vmatpush.bf16.msrb.mxu0 %v1595_v48  ;;  %549 = vmatmul.bf16.vlgmr.msra.gmra.mxu1 %v394_v55  ;;  %v1754_v48 = vld [vmem:[%s2514_s4 + $0x14] sm:$0xf0]  ;;  %v1795_v19 = vld [vmem:[%s2516_s6 + $0x60] sm:$0xff]  ;;  %v1808_v25 = vld [vmem:[%s2516_s6 + $0xc8] sm:$0xff] }
  0x38   : > { %814 = vmatpush.bf16.msrb.mxu1 %v1599_v49  ;;  %v1479_v49 = vor.u32 %v1751_v44, %v1476_v46  ;;  %v1483_v50 = vor.u32 %v1754_v48, %v1482_v47  ;;  %767 = vmatpush.bf16.msra.mxu2 %v1475_v45  ;;  %v1793_v27 = vld [vmem:[%s2516_s6 + $0x50] sm:$0xff]  ;;  %v1799_v28 = vld [vmem:[%s2516_s6 + $0x80] sm:$0xff]  ;;  %v1784_v30 = vld [vmem:[%s2516_s6 + $0x8] sm:$0xff] }
  0x39   : > { %v1792_v31 = vld [vmem:[%s2516_s6 + $0x48] sm:$0xff]  ;;  %v1783_v32 = vld [vmem:[%s2516_s6] sm:$0xff] }
  0x3a   : > { %785 = vmatpush.bf16.msra.mxu3 %v1479_v49  ;;  %v1791_v33 = vld [vmem:[%s2516_s6 + $0x40] sm:$0xff] }
  0x3b   : > { %797 = vmatpush.bf16.msrb.mxu0 %v1579_v56  ;;  %v2302_v56 = vld [vmem:[%s2516_s6 + $0xb8] sm:$0xff]  ;;  %v590_v34 = vld [vmem:[%s2515_s5] sm:$0xf] }
  0x3c   : > { %815 = vmatpush.bf16.msrb.mxu1 %v1583_v57  ;;  %v1814_v57 = vld [vmem:[%s2516_s6 + $0xf8] sm:$0xff]  ;;  %1112 = vmatpush.bf16.msrb.mxu2 %v1790_v58  ;;  %v594_v37 = vperm.slane %v590_v34, 2  ;;  %v592_v43 = vperm.slane %v590_v34, 0  ;;  %v593_v44 = vperm.slane %v590_v34, 1 }
  0x3e   : > { %1130 = vmatpush.bf16.msrb.mxu3 %v1798_v59 }
  0x3f   : > { %798 = vmatpush.bf16.msrb.mxu0 %v1563_v62  ;;  %v1866_v62 = vld [vmem:[%s2513_s3] ss:$0 sm:$0xff] }
  0x40   : > { %816 = vmatpush.bf16.msrb.mxu1 %v1567_v63  ;;  %v1789_v63 = vld [vmem:[%s2516_s6 + $0x30] sm:$0xff] }
  0x41   : > { %1113 = vmatpush.bf16.msrb.mxu2 %v1789_v63 }
  0x42   : > { %1131 = vmatpush.bf16.msrb.mxu3 %v1797_v0 }
  0x43   : > { %799 = vmatpush.bf16.msrb.mxu0 %v1547_v4  ;;  %v1788_v4 = vld [vmem:[%s2516_s6 + $0x28] sm:$0xff] }
  0x44   : > { %817 = vmatpush.bf16.msrb.mxu1 %v1551_v5  ;;  %v1796_v5 = vld [vmem:[%s2516_s6 + $0x68] sm:$0xff] }
  0x45   : > { %1114 = vmatpush.bf16.msrb.mxu2 %v1788_v4 }
  0x46   : > { %1132 = vmatpush.bf16.msrb.mxu3 %v1796_v5 }
  0x47   : > { %800 = vmatpush.bf16.msrb.mxu0 %v1531_v14 }
  0x48   : > { %818 = vmatpush.bf16.msrb.mxu1 %v1535_v17  ;;  %v1810_v17 = vld [vmem:[%s2516_s6 + $0xd8] sm:$0xff] }
  0x49   : > { %1115 = vmatpush.bf16.msrb.mxu2 %v1787_v18 }
  0x4a   : > { %1133 = vmatpush.bf16.msrb.mxu3 %v1795_v19 }
  0x4b   : > { %801 = vmatpush.bf16.msrb.mxu0 %v1515_v26  ;;  %v1785_v26 = vld [vmem:[%s2516_s6 + $0x10] sm:$0xff] }
  0x4c   : > { %819 = vmatpush.bf16.msrb.mxu1 %v1519_v29  ;;  %v1807_v29 = vld [vmem:[%s2516_s6 + $0xc0] sm:$0xff] }
  0x4d   : > { %1116 = vmatpush.bf16.msrb.mxu2 %v1786_v22 }
  0x4e   : > { %1134 = vmatpush.bf16.msrb.mxu3 %v1794_v23  ;;  %v1246_v23 = vld [vmem:[%s2518_s8 + $0x78] sm:$0xff] }
  0x4f   : > { %802 = vmatpush.bf16.msrb.mxu0 %v1499_v38  ;;  %v595_v38 = vperm.slane %v590_v34, 3  ;;  %v1236_v34 = vld [vmem:[%s2518_s8 + $0x28] sm:$0xff] }
  0x50   : > { %820 = vmatpush.bf16.msrb.mxu1 %v1503_v41 }
  0x51   : > { %1117 = vmatpush.bf16.msrb.mxu2 %v1785_v26  ;;  %v1243_v26 = vld [vmem:[%s2518_s8 + $0x60] sm:$0xff] }
  0x52   : > { %1135 = vmatpush.bf16.msrb.mxu3 %v1793_v27  ;;  %v1242_v27 = vld [vmem:[%s2518_s8 + $0x58] sm:$0xff] }
  0x53   : > { %803 = vmatpush.bf16.msrb.mxu0 %v1483_v50 }
  0x54   : > { %821 = vmatpush.bf16.msrb.mxu1 %v1487_v53 }
  0x55   : > { %1118 = vmatpush.bf16.msrb.mxu2 %v1784_v30 }
  0x56   : > { %1136 = vmatpush.bf16.msrb.mxu3 %v1792_v31  ;;  %v1239_v31 = vld [vmem:[%s2518_s8 + $0x40] sm:$0xff] }
  0x57   : > { %1148 = vmatpush.bf16.msra.mxu0 %v2302_v56 }
  0x58   : > { %1166 = vmatpush.bf16.msra.mxu1 %v1814_v57 }
  0x59   : > { %1119 = vmatpush.bf16.msrb.mxu2 %v1783_v32  ;;  %v1238_v32 = vld [vmem:[%s2518_s8 + $0x38] sm:$0xff] }
  0x5a   : > { %1137 = vmatpush.bf16.msrb.mxu3 %v1791_v33  ;;  %v1237_v33 = vld [vmem:[%s2518_s8 + $0x30] sm:$0xff] }
  0x5b   : > { %1149 = vmatpush.bf16.msra.mxu0 %v2317_v60 }
  0x5c   : > { %1167 = vmatpush.bf16.msra.mxu1 %v1813_v61 }
  0x5f   : > { %1150 = vmatpush.bf16.msra.mxu0 %v2335_v1 }
  0x60   : > { %1168 = vmatpush.bf16.msra.mxu1 %v1812_v2 }
  0x63   : > { %1151 = vmatpush.bf16.msra.mxu0 %v1803_v9 }
  0x64   : > { %1169 = vmatpush.bf16.msra.mxu1 %v1811_v10 }
  0x67   : > { %1152 = vmatpush.bf16.msra.mxu0 %v1802_v16 }
  0x68   : > { %1170 = vmatpush.bf16.msra.mxu1 %v1810_v17 }
  0x6b   : > { %1153 = vmatpush.bf16.msra.mxu0 %v1801_v20 }
  0x6c   : > { %1171 = vmatpush.bf16.msra.mxu1 %v1809_v21 }
  0x6f   : > { %1154 = vmatpush.bf16.msra.mxu0 %v1800_v24 }
  0x70   : > { %1172 = vmatpush.bf16.msra.mxu1 %v1808_v25  ;;  %v1244_v25 = vld [vmem:[%s2518_s8 + $0x68] sm:$0xff] }
  0x73   : > { %1155 = vmatpush.bf16.msra.mxu0 %v1799_v28 }
  0x74   : > { %1173 = vmatpush.bf16.msra.mxu1 %v1807_v29  ;;  %v1240_v29 = vld [vmem:[%s2518_s8 + $0x48] sm:$0xff] }
  0xb3   : > { %v536_v54 = vpop.f32.mrf.mxu0 }
  0xb4   : > { %v550_v55 = vpop.f32.mrf.mxu1  ;;  %v537_v3 = vadd.f32 %v1866_v62, %v536_v54 }
  0xb6   : > { %v551_v11 = vadd.f32 %v550_v55, %v537_v3 }
  0xbb   : > { %v538_v6 = vpop.f32.mrf.mxu0 }
  0xbc   : > { %v539_v7 = vadd.f32 %v1866_v62, %v538_v6  ;;  %v552_v8 = vpop.f32.mrf.mxu1 }
  0xbe   : > { %v553_v12 = vadd.f32 %v552_v8, %v539_v7 }
  0xc0   : > { %v556_v13 = vpack.c.bf16 %v553_v12, %v551_v11  ;;  %v555_v14 = vsub.f32 %v551_v11, %v553_v12 }
  0xc2   : > { %768 = vmatmul.bf16.vlgmr.msra.gmra.mxu2 %v556_v13  ;;  %786 = vmatmul.bf16.vlgmr.msra.gmra.mxu3 %v556_v13  ;;  %v557_v15 = vpack.c.bf16 %v555_v14, %v555_v14 }
  0xc3   : > { %804 = vmatmul.bf16.vlgmr.msrb.gmra.mxu0 %v556_v13  ;;  %822 = vmatmul.bf16.vlgmr.msrb.gmra.mxu1 %v556_v13 }
  0xc4   : > { %1815 = vmatpush.bf16.msra.mxu3 %v2302_v56  ;;  %1247 = vmatpush.msra.mxu2 %v1246_v23 }
  0xc8   : > { %1816 = vmatpush.bf16.msra.mxu3 %v2317_v60 }
  0xcc   : > { %1817 = vmatpush.bf16.msra.mxu3 %v2335_v1 }
  0xd0   : > { %1818 = vmatpush.bf16.msra.mxu3 %v1803_v9 }
  0xd2   : > { %773 = vmatmul.bf16.gmra.mxu2 %v557_v15  ;;  %791 = vmatmul.bf16.gmra.mxu3 %v557_v15 }
  0xd3   : > { %809 = vmatmul.bf16.gmra.mxu0 %v557_v15  ;;  %827 = vmatmul.bf16.gmra.mxu1 %v557_v15 }
  0xd4   : > { %1819 = vmatpush.bf16.msra.mxu3 %v1802_v16 }
  0xd8   : > { %1820 = vmatpush.bf16.msra.mxu3 %v1801_v20 }
  0xdc   : > { %1821 = vmatpush.bf16.msra.mxu3 %v1800_v24  ;;  %v1245_v24 = vld [vmem:[%s2518_s8 + $0x70] sm:$0xff] }
  0xdd   : > { %1248 = vmatpush.msra.mxu2 %v1245_v24 }
  0xdf   : > { %1249 = vmatpush.msra.mxu2 %v1244_v25 }
  0xe0   : > { %1822 = vmatpush.bf16.msra.mxu3 %v1799_v28  ;;  %v1241_v28 = vld [vmem:[%s2518_s8 + $0x50] sm:$0xff] }
  0xe1   : > { %1250 = vmatpush.msra.mxu2 %v1243_v26 }
  0xe3   : > { %1251 = vmatpush.msra.mxu2 %v1242_v27 }
  0xe5   : > { %1252 = vmatpush.msra.mxu2 %v1241_v28 }
  0xe7   : > { %1253 = vmatpush.msra.mxu2 %v1240_v29 }
  0xe9   : > { %1254 = vmatpush.msra.mxu2 %v1239_v31 }
  0xeb   : > { %1255 = vmatpush.msra.mxu2 %v1238_v32 }
  0xed   : > { %1256 = vmatpush.msra.mxu2 %v1237_v33 }
  0xef   : > { %1257 = vmatpush.msra.mxu2 %v1236_v34 }
 0x140   : > { %v805_v35 = vpop.f32.mrf.mxu0  ;;  %v823_v36 = vpop.f32.mrf.mxu1 }
 0x141   : > { %v806_v41 = vadd.f32 %v805_v35, %v594_v37  ;;  %v824_v42 = vadd.f32 %v823_v36, %v595_v38  ;;  %v1235_v35 = vld [vmem:[%s2518_s8 + $0x20] sm:$0xff] }
 0x142   : > { %1258 = vmatpush.msra.mxu2 %v1235_v35 }
 0x143   : > { %v834_v49 = vmax.f32 %v806_v41, 0.0  ;;  %v835_v50 = vmax.f32 %v824_v42, 0.0 }
 0x145   : > { %v769_v39 = vpop.f32.mrf.mxu2  ;;  %v787_v40 = vpop.f32.mrf.mxu3 }
 0x146   : > { %v770_v53 = vadd.f32 %v769_v39, %v592_v43  ;;  %v788_v54 = vadd.f32 %v787_v40, %v593_v44 }
 0x148   : > { %v807_v45 = vpop.f32.mrf.mxu0  ;;  %v825_v46 = vpop.f32.mrf.mxu1  ;;  %v832_v61 = vmax.f32 %v770_v53, 0.0  ;;  %v833_v62 = vmax.f32 %v788_v54, 0.0 }
 0x149   : > { %v808_v47 = vadd.f32 %v807_v45, %v594_v37  ;;  %v826_v48 = vadd.f32 %v825_v46, %v595_v38  ;;  %v1232_v45 = vld [vmem:[%s2518_s8 + $0x8] sm:$0xff] }
 0x14b   : > { %v838_v51 = vmax.f32 %v808_v47, 0.0  ;;  %v839_v52 = vmax.f32 %v826_v48, 0.0  ;;  %v1231_v48 = vld [vmem:[%s2518_s8] sm:$0xff] }
 0x14d   : > { %v846_v55 = vpack.c.bf16 %v838_v51, %v834_v49  ;;  %v847_v56 = vpack.c.bf16 %v839_v52, %v835_v50  ;;  %v771_v57 = vpop.f32.mrf.mxu2  ;;  %v789_v58 = vpop.f32.mrf.mxu3 }
 0x14e   : > { %v772_v59 = vadd.f32 %v771_v57, %v592_v43  ;;  %v790_v60 = vadd.f32 %v789_v58, %v593_v44 }
 0x14f   : > { %1156 = vmatmul.bf16.vlgmr.msra.gmra.mxu0 %v846_v55  ;;  %1174 = vmatmul.bf16.vlgmr.msra.gmra.mxu1 %v847_v56 }
 0x150   : > { %v836_v63 = vmax.f32 %v772_v59, 0.0  ;;  %v837_v0 = vmax.f32 %v790_v60, 0.0  ;;  %v810_v1 = vpop.f32.mrf.mxu0  ;;  %v828_v2 = vpop.f32.mrf.mxu1 }
 0x151   : > { %v829_v5 = vadd.f32 %v828_v2, %v595_v38  ;;  %v811_v20 = vadd.f32 %v810_v1, %v594_v37  ;;  %v1867_v37 = vld [vmem:[%s2517_s7] ss:$0 sm:$0xff]  ;;  %v1234_v38 = vld [vmem:[%s2518_s8 + $0x18] sm:$0xff] }
 0x152   : > { %v844_v3 = vpack.c.bf16 %v836_v63, %v832_v61  ;;  %v845_v4 = vpack.c.bf16 %v837_v0, %v833_v62  ;;  %1259 = vmatpush.msra.mxu2 %v1234_v38 }
 0x153   : > { %v843_v10 = vmax.f32 %v829_v5, 0.0  ;;  %v842_v21 = vmax.f32 %v811_v20, 0.0 }
 0x154   : > { %1120 = vmatmul.bf16.vlgmr.msrb.gmra.mxu2 %v844_v3  ;;  %1138 = vmatmul.bf16.vlgmr.msrb.gmra.mxu3 %v845_v4 }
 0x155   : > { %v774_v6 = vpop.f32.mrf.mxu2  ;;  %v792_v7 = vpop.f32.mrf.mxu3  ;;  %v851_v15 = vpack.c.bf16 %v843_v10, %v843_v10  ;;  %v850_v22 = vpack.c.bf16 %v842_v21, %v842_v21 }
 0x156   : > { %v775_v11 = vadd.f32 %v774_v6, %v592_v43  ;;  %v793_v12 = vadd.f32 %v792_v7, %v593_v44  ;;  %v1233_v43 = vld [vmem:[%s2518_s8 + $0x10] sm:$0xff] }
 0x157   : > { %1260 = vmatpush.msra.mxu2 %v1233_v43 }
 0x158   : > { %v812_v8 = vpop.f32.mrf.mxu0  ;;  %v830_v9 = vpop.f32.mrf.mxu1  ;;  %v840_v16 = vmax.f32 %v775_v11, 0.0  ;;  %v841_v17 = vmax.f32 %v793_v12, 0.0 }
 0x159   : > { %1261 = vmatpush.msra.mxu2 %v1232_v45 }
 0x15a   : > { %v848_v18 = vpack.c.bf16 %v840_v16, %v840_v16  ;;  %v849_v19 = vpack.c.bf16 %v841_v17, %v841_v17 }
 0x15b   : > { %1262 = vmatpush.msra.mxu2 %v1231_v48 }
 0x15d   : > { %v776_v13 = vpop.f32.mrf.mxu2  ;;  %v794_v14 = vpop.f32.mrf.mxu3 }
 0x15f   : > { %1179 = vmatmul.bf16.gmra.mxu1 %v851_v15 }
 0x164   : > { %1125 = vmatmul.bf16.gmra.mxu2 %v848_v18  ;;  %1143 = vmatmul.bf16.gmra.mxu3 %v849_v19 }
 0x174   : > { %1161 = vmatmul.bf16.vlgmr.msra.gmra.mxu3 %v850_v22 }
 0x1cc   : > { %v1175_v30 = vpop.f32.mrf.mxu1  ;;  %v1157_v42 = vpop.f32.mrf.mxu0 }
 0x1d4   : > { %v1177_v36 = vpop.f32.mrf.mxu1  ;;  %v1159_v56 = vpop.f32.mrf.mxu0 }
 0x1d7   : > { %v1121_v39 = vpop.f32.mrf.mxu2  ;;  %v1139_v40 = vpop.f32.mrf.mxu3 }
 0x1d8   : > { %v1122_v41 = vadd.f32 %v1867_v37, %v1121_v39 }
 0x1da   : > { %v1140_v44 = vadd.f32 %v1139_v40, %v1122_v41 }
 0x1dc   : > { %v1158_v46 = vadd.f32 %v1157_v42, %v1140_v44  ;;  %v1180_v47 = vpop.f32.mrf.mxu1 }
 0x1de   : > { %v1176_v49 = vadd.f32 %v1175_v30, %v1158_v46 }
 0x1df   : > { %v1123_v50 = vpop.f32.mrf.mxu2  ;;  %v1141_v51 = vpop.f32.mrf.mxu3 }
 0x1e0   : > { %1184 = vst [vmem:[%s2467_s20] sm:$0xff] %v1176_v49  ;;  %v1189_v52 = vsub.f32 0.0, %v1176_v49  ;;  %v1124_v53 = vadd.f32 %v1867_v37, %v1123_v50 }
 0x1e2   : > { %v1190_v54 = vmul.f32 1.442695, %v1189_v52  ;;  %v1142_v55 = vadd.f32 %v1141_v51, %v1124_v53 }
 0x1e4   : > { %1868 = vpow2.f32 %v1190_v54  ;;  %v1160_v57 = vadd.f32 %v1159_v56, %v1142_v55  ;;  %v1182_v58 = vpop.f32.mrf.mxu1 }
 0x1e6   : > { %v1178_v59 = vadd.f32 %v1177_v36, %v1160_v57 }
 0x1e7   : > { %v1126_v60 = vpop.f32.mrf.mxu2  ;;  %v1144_v61 = vpop.f32.mrf.mxu3 }
 0x1e8   : > { %1728 = vst [vmem:[%s2467_s20 + $0x8] sm:$0xff] %v1178_v59  ;;  %v1127_v2 = vadd.f32 %v1867_v37, %v1126_v60 }
 0x1ea   : > { %v1869_v62 = vpop.eup %1868  ;;  %v1145_v5 = vadd.f32 %v1144_v61, %v1127_v2 }
 0x1eb   : > { %v1192_v63 = vadd.f32 1.0, %v1869_v62 }
 0x1ed   : > { %1870 = vrcp.f32 %v1192_v63  ;;  %v1204_v8 = vand.u32 2147483648, %v1192_v63  ;;  %v1202_v11 = vand.u32 2147483647, %v1192_v63  ;;  %vm1198_vm1 = vweird.f32 %v1192_v63 }
 0x1ef   : > { %v1128_v0 = vpop.f32.mrf.mxu2  ;;  %v1146_v1 = vpop.f32.mrf.mxu3  ;;  %v1205_v14 = vor.u32 1.1754944e-38, %v1204_v8  ;;  %vm1203_vm3 = vcmp.eq.f32.partialorder %v1202_v11, 8.507059e+37 }
 0x1f3   : > { %v1871_v3 = vpop.eup %1870 }
 0x1f4   : > { %v1194_v4 = vmul.f32 %v1871_v3, %v1192_v63  ;;  %vm1199_vm0 = vweird.f32 %v1871_v3 }
 0x1f5   : > { %vm1200_vm2 = vmor %vm1198_vm1, %vm1199_vm0 }
 0x1f6   : > { %v1195_v6 = vsub.f32 1.0, %v1194_v4 }
 0x1f7   : > { %v1162_v7 = vpop.f32.mrf.mxu3 }
 0x1f8   : > { %v1163_v9 = vadd.f32 %v1162_v7, %v1145_v5  ;;  %v1196_v10 = vmul.f32 %v1871_v3, %v1195_v6 }
 0x1fa   : > { %v1181_v12 = vadd.f32 %v1180_v47, %v1163_v9  ;;  %v1197_v13 = vadd.f32 %v1871_v3, %v1196_v10 }
 0x1fc   : > { %1729 = vst [vmem:[%s2467_s20 + $0x10] sm:$0xff] %v1181_v12  ;;  %v1207_v15 = vadd.f32 %v1181_v12, %v1178_v59  ;;  %v1201_v16 = vsel %vm1200_vm2, %v1871_v3, %v1197_v13 }
 0x1fd   : > { %v1206_v17 = vsel %vm1203_vm3, %v1205_v14, %v1201_v16 }
 0x1fe   : > { %v1208_v18 = vsub.f32 0.0, %v1207_v15  ;;  %1263 = vmatmul.f32.vlgmr.msra.gmra.mxu2 %v1206_v17 }
 0x1ff   : > { %v1164_v19 = vpop.f32.mrf.mxu3 }
 0x200   : > { %v1209_v20 = vmul.f32 1.442695, %v1208_v18 }
 0x202   : > { %1872 = vpow2.f32 %v1209_v20 }
 0x208   : > { %v1873_v21 = vpop.eup %1872 }
 0x209   : > { %v1211_v22 = vadd.f32 1.0, %v1873_v21 }
 0x20b   : > { %1874 = vrcp.f32 %v1211_v22  ;;  %v1223_v26 = vand.u32 2147483648, %v1211_v22  ;;  %v1221_v28 = vand.u32 2147483647, %v1211_v22  ;;  %vm1217_vm5 = vweird.f32 %v1211_v22 }
 0x20d   : > { %v1224_v30 = vor.u32 1.1754944e-38, %v1223_v26  ;;  %vm1222_vm7 = vcmp.eq.f32.partialorder %v1221_v28, 8.507059e+37 }
 0x211   : > { %v1875_v23 = vpop.eup %1874 }
 0x212   : > { %v1213_v24 = vmul.f32 %v1875_v23, %v1211_v22  ;;  %vm1218_vm4 = vweird.f32 %v1875_v23 }
 0x213   : > { %vm1219_vm6 = vmor %vm1217_vm5, %vm1218_vm4 }
 0x214   : > { %v1214_v25 = vsub.f32 1.0, %v1213_v24 }
 0x216   : > { %v1215_v27 = vmul.f32 %v1875_v23, %v1214_v25 }
 0x218   : > { %v1216_v29 = vadd.f32 %v1875_v23, %v1215_v27 }
 0x21a   : > { %v1220_v31 = vsel %vm1219_vm6, %v1875_v23, %v1216_v29 }
 0x21b   : > { %v1225_v32 = vsel %vm1222_vm7, %v1224_v30, %v1220_v31 }
 0x21c   : > { %v1226_v33 = vsub.f32 %v1206_v17, %v1225_v32 }
 0x21e   : > { %v1227_v34 = vmul.f32 %v1226_v33, %v1226_v33 }
 0x220   : > { %1228 = vadd.xlane.f32.xlu0 %v1227_v34 }
 0x221   : > { %1903 = shalt.err (!%p1900_p3)
}
 0x222   : > { %s1940_s26 = smov 128   ;;  %s1941_s28 = smov 256   ;;  %v1271_v37 = vlaneseq }
 0x223   : > { %s1942_s15 = smov 8   ;;  %s1407_s19 = sshll.u32 %s2119_s27, 3 }
 0x224   : > { %1824 = dma.vmem_to_hbm [thread:$0]  (%p2036_p5), %s1296_s25, 384, %s1298_s29, %s1280_s30, %s1940_s26, %s1941_s28, %s1942_s15   ;;  %v1272_v39 = vand.u32 127, %v1271_v37 }
 0x225   : > { %s388_s12 = scalar_lea.vmem %s2520_s10, %s1407_s19 }
 0x226   : > { %vm1275_vm8 = vcmp.eq.s32.totalorder %v1272_v39, 1  ;;  %vm1273_vm9 = vcmp.eq.s32.totalorder %v1272_v39, 0 }
 0x281   : > { %v1264_v35 = vpop.f32.mrf.mxu2 }
 0x282   : > { %v1267_v36 = vmul.f32 %v1264_v35, %v1206_v17 }
 0x284   : > { %1268 = vadd.xlane.f32.xlu0 %v1267_v36 }
 0x293   : > { %v1229_v38 = vpop.xlane.xlu0 %1228 }
 0x294   : > { %v1230_v40 = vmul.f32 0.0078125, %v1229_v38 }
 0x296   : > { %v1276_v43 = vsel %vm1275_vm8, %v1230_v40, 0.0 }
 0x2f7   : > { %v1269_v41 = vpop.xlane.xlu0 %1268 }
 0x2f8   : > { %v1270_v42 = vmul.f32 0.0078125, %v1269_v41 }
 0x2fa   : > { %v1274_v44 = vsel %vm1273_vm9, %v1270_v42, 0.0 }
 0x2fb   : > { %v1277_v45 = vadd.f32 %v1276_v43, %v1274_v44 }
 0x2fd   : > { %1278 = vst [vmem:[%s388_s12] sm:$0xff] %v1277_v45 }
 0x2fe PF: > { %p1830_p4 = scmp.ge.s32.totalorder %s1938_s16, 2  ;;  %s1315_s25 = sand.u32 1, %s1926_s13  }
 0x2ff   : > { %s1316_s27 = scalar_lea.sflag [#allocation3], %s1315_s25 }
 0x300   : > { %p1827_p5 = pnand %p1830_p4, %p2040_p6 }
 0x302   : > { %p1828_p7 = pneg %p1827_p5 }
 0x304   : > { %1921 = dma.done.wait (%p1828_p7), %s1316_s27, 384  }
 0x305   : > { %1923 = vsyncadd (%p1828_p7), %s1316_s27, 4294966912  ;;  %s2532_s16 = sld [smem:[#allocation6_spill]]  ;;  %s2535_s13 = smov %s1930_s14 }
 0x306   : > { %s2533_s29 = sld [smem:[#allocation5_spill]] }
 0x307   : > { %s2534_s15 = sld [smem:[#allocation7_spill]] }
 0x30b   : > { %p21_p8 = scmp.ge.s32.totalorder %s2532_s16, 4  }
 0x30c   : > { %s2536_s14 = smov %s2533_s29 }
 0x30d   :  { %23 = sbr.rel (!%p21_p8) target bundleno = 3 (0x3), region = 108 }
 0x312   :  { %1329 = vsyncpa [#allocation3], 1 }
 0x313   :  { %1331 = vsyncpa [#allocation3 + $0x1], 1 }

</bundles_post_ra>
